<compile_context>
chip_gen: v7x
topology: tpu7x:2x2x1
jax: 0.10.0
libtpu: 0.0.40
codegen_flags: <defaults>
</compile_context>

<pallas_src>
import functools

import jax
import jax.numpy as jnp
from jax import lax
from jax.experimental import pallas as pl
from jax.experimental.pallas import tpu as pltpu


# ---------------------------------------------------------------------------
# Helpers
# ---------------------------------------------------------------------------
@functools.lru_cache(maxsize=None)
def _vmem_limit_bytes():
    """Half of physical VMEM (64 MiB on v5e/v6e, 32 MiB on v7x), conservative fallback."""
    try:
        cap = int(pltpu.get_tpu_info().vmem_capacity_bytes)
    except Exception:
        cap = 64 * 1024 * 1024
    return int(min(cap // 2, 96 * 1024 * 1024))


def _round_up(n, m):
    return ((n + m - 1) // m) * m


def _fit_tile(dim, pref, align):
    """Largest aligned tile <= pref that divides `dim`; falls back to full dim."""
    if dim <= pref:
        return dim
    t = (pref // align) * align
    while t >= align:
        if dim % t == 0:
            return t
        t -= align
    return dim


# ---------------------------------------------------------------------------
# Tiled matmul kernel (QKV / output projections and pair-bias precompute)
# ---------------------------------------------------------------------------
def _matmul_kernel(x_ref, w_ref, o_ref, acc_ref):
    @pl.when(pl.program_id(2) == 0)
    def _init():
        acc_ref[...] = jnp.zeros_like(acc_ref)

    acc_ref[...] += jnp.dot(
        x_ref[...], w_ref[...], preferred_element_type=jnp.float32
    )

    @pl.when(pl.program_id(2) == pl.num_programs(2) - 1)
    def _finalize():
        o_ref[...] = acc_ref[...].astype(o_ref.dtype)


def pallas_linear(x2d, w, *, tm=512, tn=512, tk=1024):
    """x2d: (M, K), w: (K, N) -> (M, N). Tiled, pipelined, f32-accumulated.

    Inputs are zero-padded to tile multiples (zero K-padding contributes
    nothing), so awkward shapes never produce an oversized single block.
    """
    M, K = x2d.shape
    K2, N = w.shape
    assert K == K2
    tm = min(tm, _round_up(M, 8))
    tn = min(tn, _round_up(N, 128))
    tk = min(tk, _round_up(K, 128))
    Mp, Np, Kp = _round_up(M, tm), _round_up(N, tn), _round_up(K, tk)

    xp = x2d if (Mp == M and Kp == K) else jnp.pad(x2d, ((0, Mp - M), (0, Kp - K)))
    wp = w if (Kp == K and Np == N) else jnp.pad(w, ((0, Kp - K), (0, Np - N)))

    out = pl.pallas_call(
        _matmul_kernel,
        out_shape=jax.ShapeDtypeStruct((Mp, Np), x2d.dtype),
        grid=(Mp // tm, Np // tn, Kp // tk),
        in_specs=[
            pl.BlockSpec((tm, tk), lambda i, j, k: (i, k)),
            pl.BlockSpec((tk, tn), lambda i, j, k: (k, j)),
        ],
        out_specs=pl.BlockSpec((tm, tn), lambda i, j, k: (i, j)),
        scratch_shapes=[pltpu.VMEM((tm, tn), jnp.float32)],
        compiler_params=pltpu.CompilerParams(
            dimension_semantics=("parallel", "parallel", "arbitrary"),
            vmem_limit_bytes=_vmem_limit_bytes(),
        ),
    )(xp, wp)

    if Mp != M or Np != N:
        out = out[:M, :N]
    return out


# ---------------------------------------------------------------------------
# Flash-style attention kernel. Grid = (B, T/tq, T/tk); online softmax over
# the KV axis; precomputed pair bias streamed as (H, tq, tk) tiles; gating
# fused; lane-dense (B, T, H*D) output.
# ---------------------------------------------------------------------------
def _attn_kernel(qg_ref, kv_ref, *refs, heads, dim_head, has_bias):
    if has_bias:
        sb_ref, o_ref, m_ref, l_ref, acc_ref = refs
    else:
        o_ref, m_ref, l_ref, acc_ref = refs

    hd = heads * dim_head
    ki = pl.program_id(2)

    @pl.when(ki == 0)
    def _init():
        m_ref[...] = jnp.full(m_ref.shape, -jnp.inf, m_ref.dtype)
        l_ref[...] = jnp.zeros(l_ref.shape, l_ref.dtype)
        acc_ref[...] = jnp.zeros(acc_ref.shape, acc_ref.dtype)

    qg = qg_ref[...]   # (tq, 2*hd): q | g, per-head-contiguous lanes, q pre-scaled
    kv = kv_ref[...]   # (tk, 2*hd): k | v, per-head-contiguous lanes

    # Scores for all heads: H small MXU dots (contracting dim_head of both
    # operands, no k^T materialized), stacked once to (H, tq, tk) so the
    # softmax bookkeeping runs batched over heads.
    s_heads = []
    for h in range(heads):
        lo = h * dim_head
        qh = qg[:, lo:lo + dim_head]                      # (tq, D)
        kh = kv[:, lo:lo + dim_head]                      # (tk, D)
        s_heads.append(
            lax.dot_general(qh, kh, (((1,), (1,)), ((), ())),
                            preferred_element_type=jnp.float32))
    s = jnp.stack(s_heads, axis=0)                        # (H, tq, tk) f32

    if has_bias:
        s = s + sb_ref[...].astype(jnp.float32)           # precomputed bias tile

    # Online softmax (batched over heads).
    m_prev = m_ref[...]                                   # (H, tq, 1)
    m_new = jnp.maximum(m_prev, jnp.max(s, axis=-1, keepdims=True))
    alpha = jnp.exp(m_prev - m_new)
    p = jnp.exp(s - m_new)                                # (H, tq, tk)
    l_ref[...] = alpha * l_ref[...] + jnp.sum(p, axis=-1, keepdims=True)
    m_ref[...] = m_new

    # P @ V per head, accumulated into f32 scratch.
    for h in range(heads):
        lo = hd + h * dim_head
        vh = kv[:, lo:lo + dim_head]                      # (tk, D)
        ph = p[h].astype(vh.dtype)                        # (tq, tk)
        pv = jnp.dot(ph, vh, preferred_element_type=jnp.float32)   # (tq, D)
        acc_ref[h] = alpha[h] * acc_ref[h] + pv

    @pl.when(ki == pl.num_programs(2) - 1)
    def _finalize():
        inv_l = pl.reciprocal(l_ref[...], approx=True)    # (H, tq, 1), EUP
        gate = jax.nn.sigmoid(qg[:, hd:].astype(jnp.float32))   # (tq, hd)
        for h in range(heads):
            lo = h * dim_head
            oh = acc_ref[h] * inv_l[h]                    # (tq, D)
            oh = oh * gate[:, lo:lo + dim_head]
            o_ref[:, lo:lo + dim_head] = oh.astype(o_ref.dtype)


def pallas_attention(qg, kv, sb, *, heads, dim_head):
    """qg: (B, T, 2*H*D) packed q|g (q pre-scaled), kv: (B, T, 2*H*D) packed k|v,
    sb: (H, T, T) precomputed pair bias or None.  Returns (B, T, H*D)."""
    B, T, F = qg.shape
    hd = heads * dim_head
    assert F == 2 * hd and kv.shape == (B, T, 2 * hd)
    has_bias = sb is not None

    tq = _fit_tile(T, 256, 8)
    tk = _fit_tile(T, 512, 128)
    grid = (B, T // tq, T // tk)

    kern = functools.partial(
        _attn_kernel, heads=heads, dim_head=dim_head, has_bias=has_bias
    )

    in_specs = [
        pl.BlockSpec((None, tq, 2 * hd), lambda b, qi, ki: (b, qi, 0)),
        pl.BlockSpec((None, tk, 2 * hd), lambda b, qi, ki: (b, ki, 0)),
    ]
    args = [qg, kv]
    if has_bias:
        in_specs.append(pl.BlockSpec((heads, tq, tk), lambda b, qi, ki: (0, qi, ki)))
        args.append(sb)

    return pl.pallas_call(
        kern,
        out_shape=jax.ShapeDtypeStruct((B, T, hd), qg.dtype),
        grid=grid,
        in_specs=in_specs,
        out_specs=pl.BlockSpec((None, tq, hd), lambda b, qi, ki: (b, qi, 0)),
        scratch_shapes=[
            pltpu.VMEM((heads, tq, 1), jnp.float32),          # running max
            pltpu.VMEM((heads, tq, 1), jnp.float32),          # running denom
            pltpu.VMEM((heads, tq, dim_head), jnp.float32),   # output accumulator
        ],
        compiler_params=pltpu.CompilerParams(
            dimension_semantics=("parallel", "parallel", "arbitrary"),
            vmem_limit_bytes=_vmem_limit_bytes(),
        ),
    )(*args)


# ---------------------------------------------------------------------------
# MHSA module (parameters initialized deterministically in-script)
# ---------------------------------------------------------------------------
class MHSAPallas:
    def __init__(self, c_m, c_z, heads=8, dim_head=None, bias=True, *, key):
        self.bias = bias
        self.dim_head = c_m // heads if dim_head is None else dim_head
        self.heads = heads
        self._dim = self.dim_head * heads
        self.scale = self.dim_head ** (-0.5)

        k1, k2, k3, k4 = jax.random.split(key, 4)
        # Canonical (torch-equivalent, x @ W) parameters.
        self.w_qkv = jax.random.normal(k1, (c_m, self._dim * 4), jnp.float32) * (c_m ** -0.5)
        self.w_0 = jax.random.normal(k2, (self._dim, c_m), jnp.float32) * (self._dim ** -0.5)
        self.w_sb = jax.random.normal(k3, (c_z, heads), jnp.float32) * (c_z ** -0.5)
        self.b_sb = jax.random.normal(k4, (heads,), jnp.float32) * 0.02

        # Split + permute the QKV weight columns once at init:
        #   torch channel order: c = (d*4 + k)*heads + h   (rearrange '(d k h)')
        #   kernel layout: q|g and k|v blocks, per-head-contiguous (h*D + d).
        # The attention scale is folded into the q columns (free at init).
        def gather(k_idx, scl=1.0):
            hh = jnp.arange(heads)[:, None]
            dd = jnp.arange(self.dim_head)[None, :]
            src = ((dd * 4 + k_idx) * heads + hh).reshape(-1)
            return self.w_qkv[:, src] * scl

        self.w_qg = jnp.concatenate([gather(0, self.scale), gather(3)], axis=1)
        self.w_kv = jnp.concatenate([gather(1), gather(2)], axis=1)

    def __call__(self, x, bias_rep=None):
        # TODO(synk): the optional attention `mask` path of the PyTorch forward
        # is not implemented.
        B, T, c_m = x.shape
        h, d = self.heads, self.dim_head
        hd = h * d

        x2d = x.reshape(B * T, c_m)
        qg = pallas_linear(x2d, self.w_qg).reshape(B, T, 2 * hd)   # q|g, q pre-scaled
        kv = pallas_linear(x2d, self.w_kv).reshape(B, T, 2 * hd)   # k|v

        sb = None
        if self.bias:
            # Pair-bias projection: one MXU matmul, computed ONCE per call
            # (it is batch-independent), then streamed as (H, tq, tk) tiles.
            sb = pallas_linear(bias_rep.reshape(T * T, -1), self.w_sb) + self.b_sb
            sb = jnp.transpose(sb.reshape(T, T, h), (2, 0, 1))      # (H, T, T)

        out = pallas_attention(qg, kv, sb, heads=h, dim_head=d)     # (B, T, hd)
        return pallas_linear(out.reshape(B * T, hd), self.w_0).reshape(B, T, c_m)


# ---------------------------------------------------------------------------
# Pure-JAX reference (mirrors the PyTorch forward) for verification
# ---------------------------------------------------------------------------
def mhsa_reference(mod, x, bias_rep):
    B, T, c_m = x.shape
    h, d = mod.heads, mod.dim_head
    qkv = x @ mod.w_qkv
    qkv = qkv.reshape(B, T, d, 4, h).transpose(3, 0, 4, 1, 2)   # 'b t (d k h) -> k b h t d'
    q, k, v, g = qkv[0], qkv[1], qkv[2], qkv[3]
    sdp = jnp.einsum("bhid,bhjd->bhij", q, k) * mod.scale
    if mod.bias:
        sb = bias_rep @ mod.w_sb + mod.b_sb                     # (T, T, h)
        sdp = sdp + jnp.transpose(sb, (2, 0, 1))[None]          # (1, h, T, T)
    attn = jax.nn.softmax(sdp, axis=-1)
    out = jnp.einsum("bhij,bhjd->bhid", attn, v)
    out = out * jax.nn.sigmoid(g)
    out = out.transpose(0, 2, 1, 3).reshape(B, T, h * d)
    return out @ mod.w_0


# ---------------------------------------------------------------------------
if __name__ == "__main__":
    B, T, c_m, c_z, heads = 2, 8, 32, 16, 8   # dim_head = c_m / heads = 4

    key = jax.random.PRNGKey(0)
    k_mod, k_x, k_b = jax.random.split(key, 3)

    mod = MHSAPallas(c_m, c_z, heads=heads, key=k_mod)
    x = jax.random.normal(k_x, (B, T, c_m), jnp.float32)
    bias_rep = jax.random.normal(k_b, (T, T, c_z), jnp.float32)

    y = jax.block_until_ready(mod(x, bias_rep))
    y_ref = jax.block_until_ready(mhsa_reference(mod, x, bias_rep))

    assert y.shape == (B, T, c_m)
    max_err = float(jnp.max(jnp.abs(y - y_ref)))
    assert jnp.allclose(y, y_ref, rtol=2e-2, atol=2e-2), max_err

    print("KERNEL_OK")
</pallas_src>

<mosaic_0001>
module attributes {stable_mosaic.version = 11 : i64} {
  func.func @_matmul_kernel(%arg0: i32, %arg1: i32, %arg2: i32, %arg3: memref<16x128xf32, #tpu.memory_space<vmem>>, %arg4: memref<128x128xf32, #tpu.memory_space<vmem>>, %arg5: memref<16x128xf32, #tpu.memory_space<vmem>>, %arg6: memref<16x128xf32, #tpu.memory_space<vmem>>) attributes {dimension_semantics = [#tpu.dimension_semantics<parallel>, #tpu.dimension_semantics<parallel>, #tpu.dimension_semantics<arbitrary>], iteration_bounds = array<i64: 1, 1, 1>, scalar_prefetch = 0 : i64, scratch_operands = 1 : i64, tpu.core_type = #tpu.core_type<tc>, window_params = [{transform_indices = @transform_0, window_bounds = array<i64: 16, 128>}, {transform_indices = @transform_1, window_bounds = array<i64: 128, 128>}, {transform_indices = @transform_2, window_bounds = array<i64: 16, 128>}]} {
    %c0_i32 = arith.constant 0 : i32
    %0 = arith.cmpi eq, %arg2, %c0_i32 : i32
    %1 = arith.extui %0 : i1 to i32
    %c0_i32_0 = arith.constant 0 : i32
    %2 = arith.cmpi ne, %1, %c0_i32_0 : i32
    scf.if %2 {
      %cst_10 = arith.constant 0.000000e+00 : f32
      %12 = vector.broadcast %cst_10 : f32 to vector<16x128xf32>
      %c0_11 = arith.constant 0 : index
      %c0_12 = arith.constant 0 : index
      %13 = vector.load %arg6[%c0_11, %c0_12] : memref<16x128xf32, #tpu.memory_space<vmem>>, vector<16x128xf32>
      tpu.vector_store %arg6[%c0_11, %c0_12], %12 {strides = array<i32>} : memref<16x128xf32, #tpu.memory_space<vmem>>, vector<16x128xf32>,
    } else {
    }
    %c0 = arith.constant 0 : index
    %c0_1 = arith.constant 0 : index
    %3 = vector.load %arg6[%c0, %c0_1] : memref<16x128xf32, #tpu.memory_space<vmem>>, vector<16x128xf32>
    %c0_2 = arith.constant 0 : index
    %c0_3 = arith.constant 0 : index
    %4 = vector.load %arg3[%c0_2, %c0_3] : memref<16x128xf32, #tpu.memory_space<vmem>>, vector<16x128xf32>
    %c0_4 = arith.constant 0 : index
    %c0_5 = arith.constant 0 : index
    %5 = vector.load %arg4[%c0_4, %c0_5] : memref<128x128xf32, #tpu.memory_space<vmem>>, vector<128x128xf32>
    %cst = arith.constant dense<0.000000e+00> : vector<16x128xf32>
    %6 = tpu.matmul %4, %5, %cst {dimension_numbers = #tpu.dot_dimension_numbers<[1], [0], [0], [1], [0, 0, 1, 1], [], []>} : vector<16x128xf32>, vector<128x128xf32>, vector<16x128xf32> -> vector<16x128xf32>
    %7 = arith.addf %3, %6 : vector<16x128xf32>
    %c0_6 = arith.constant 0 : index
    %c0_7 = arith.constant 0 : index
    %8 = vector.load %arg6[%c0_6, %c0_7] : memref<16x128xf32, #tpu.memory_space<vmem>>, vector<16x128xf32>
    tpu.vector_store %arg6[%c0_6, %c0_7], %7 {strides = array<i32>} : memref<16x128xf32, #tpu.memory_space<vmem>>, vector<16x128xf32>,
    %c0_i32_8 = arith.constant 0 : i32
    %9 = arith.cmpi eq, %arg2, %c0_i32_8 : i32
    %10 = arith.extui %9 : i1 to i32
    %c0_i32_9 = arith.constant 0 : i32
    %11 = arith.cmpi ne, %10, %c0_i32_9 : i32
    scf.if %11 {
      %c0_10 = arith.constant 0 : index
      %c0_11 = arith.constant 0 : index
      %12 = vector.load %arg6[%c0_10, %c0_11] : memref<16x128xf32, #tpu.memory_space<vmem>>, vector<16x128xf32>
      %c0_12 = arith.constant 0 : index
      %c0_13 = arith.constant 0 : index
      %13 = vector.load %arg5[%c0_12, %c0_13] : memref<16x128xf32, #tpu.memory_space<vmem>>, vector<16x128xf32>
      tpu.vector_store %arg5[%c0_12, %c0_13], %12 {strides = array<i32>} : memref<16x128xf32, #tpu.memory_space<vmem>>, vector<16x128xf32>,
    } else {
    }
    return
  }
  func.func @transform_0(%arg0: i32, %arg1: i32, %arg2: i32) -> (i32, i32) {
    %c0_i32 = arith.constant 0 : i32
    return %arg0, %arg2 : i32, i32
  }
  func.func @transform_1(%arg0: i32, %arg1: i32, %arg2: i32) -> (i32, i32) {
    %c0_i32 = arith.constant 0 : i32
    return %arg2, %arg1 : i32, i32
  }
  func.func @transform_2(%arg0: i32, %arg1: i32, %arg2: i32) -> (i32, i32) {
    %c0_i32 = arith.constant 0 : i32
    return %arg0, %arg1 : i32, i32
  }
}

</mosaic_0001>

<bundles_post_ra>
// kernel: tpu_custom_call.1
= control target key start
LH: loop header
LB: loop body
LE: loop exit
PB: predicated region body
PF: predicated region fallthrough
CT: control target
= control target key end

     0   :  { %7 = vsyncpa [#allocation4], 0  ;;  %s397_s0 = inlined_call_operand.hbm [shape: f32[16,128], index: 0, kind: input, shape index: {}]   ;;  %s398_s1 = inlined_call_operand.hbm [shape: f32[128,128], index: 1, kind: input, shape index: {}]   ;;  %s399_s2 = inlined_call_operand.hbm [shape: f32[16,128], index: 2, kind: output, shape index: {}]  }
   0x1   :  { %8 = vsyncpa [#allocation7], 0 }
   0x2   :  { %9 = vsyncpa [#allocation5], 0  ;;  %s332_s9 = smov [#allocation3]   ;;  %s260_s13 = scalar_lea.hbm %s397_s0, 256 }
   0x3   :  { %s15_s10 = sshll.u32 %s332_s9, 4  ;;  %p261_p0 = scmp.ne.s32.totalorder %s397_s0, %s260_s13  ;;  %s16_s10 = int_to_ptr.vmem [resolvable:$true] %s15_s10 }
   0x4   :  { %p264_p1 = scmp.lt.u32.totalorder %s260_s13, %s397_s0 }
   0x6   :  { %p266_p2 = pnand %p264_p1, %p261_p0 }
   0x8   :  { %269 = shalt.err (!%p266_p2)
}
   0x9   :  { %s270_s18 = scalar_lea.vmem %s16_s10, 256  ;;  %p275_p4 = scmp.lt.s32.totalorder %s16_s10, %s16_s10 }
   0xa   :  { %p271_p3 = scmp.ne.s32.totalorder %s16_s10, %s270_s18  ;;  %p276_p5 = scmp.lt.s32.totalorder %s270_s18, %s270_s18 }
   0xc   :  { %p277_p6 = por %p276_p5, %p275_p4 }
   0xe   :  { %p278_p7 = pnand %p277_p6, %p271_p3 }
  0x10   :  { %281 = shalt.err (!%p278_p7)
}
  0x11   :  { %s333_s19 = smov 128   ;;  %s334_s20 = smov 8  }
  0x12   :  { %21 = dma.hbm_to_vmem [thread:$0]  %s397_s0, 256, %s16_s10, [#allocation4], %s333_s19, %s333_s19, %s334_s20  }
  0x13   :  { %s335_s23 = smov [#allocation6]   ;;  %s282_s27 = scalar_lea.hbm %s398_s1, 2048 }
  0x14   :  { %s27_s24 = sshll.u32 %s335_s23, 4  ;;  %p283_p8 = scmp.ne.s32.totalorder %s398_s1, %s282_s27  ;;  %s28_s24 = int_to_ptr.vmem [resolvable:$true] %s27_s24 }
  0x15   :  { %p286_p9 = scmp.lt.u32.totalorder %s282_s27, %s398_s1 }
  0x17   :  { %p288_p10 = pnand %p286_p9, %p283_p8 }
  0x19   :  { %291 = shalt.err (!%p288_p10)
}
  0x1a   :  { %s292_s4 = scalar_lea.vmem %s28_s24, 2048  ;;  %p297_p12 = scmp.lt.s32.totalorder %s28_s24, %s28_s24 }
  0x1b   :  { %p293_p11 = scmp.ne.s32.totalorder %s28_s24, %s292_s4  ;;  %p298_p13 = scmp.lt.s32.totalorder %s292_s4, %s292_s4 }
  0x1d   :  { %p299_p0 = por %p298_p13, %p297_p12 }
  0x1f   :  { %p300_p1 = pnand %p299_p0, %p293_p11 }
  0x21   :  { %303 = shalt.err (!%p300_p1)
}
  0x22   :  { %33 = dma.hbm_to_vmem [thread:$0]  %s398_s1, 2048, %s28_s24, [#allocation7], %s333_s19, %s333_s19, %s334_s20  }
  0x23   :  { %326 = dma.done.wait [#allocation4], 256  }
  0x24   :  { %327 = vsyncadd [#allocation4], 4294967040 }
  0x25   :  { %328 = dma.done.wait [#allocation7], 2048  }
  0x26   :  { %329 = vsyncadd [#allocation7], 4294965248  ;;  %v50_v0 = vld [vmem:[#allocation6] sm:$0xff]  ;;  %v51_v1 = vld [vmem:[#allocation6 + $0x8] sm:$0xff]  ;;  %s336_s1 = smov [#allocation8]  }
  0x27   :  { %v52_v2 = vld [vmem:[#allocation6 + $0x10] sm:$0xff]  ;;  %v223_v3 = vpack.c.bf16 %v51_v1, %v50_v0  ;;  %v53_v4 = vld [vmem:[#allocation6 + $0x18] sm:$0xff]  ;;  %v54_v6 = vld [vmem:[#allocation6 + $0x20] sm:$0xff]  ;;  %s157_s6 = sshll.u32 %s336_s1, 4  ;;  %s158_s6 = int_to_ptr.vmem [resolvable:$true] %s157_s6 }
  0x28   :  { %v227_v5 = vpack.c.bf16 %v53_v4, %v52_v2  ;;  %v55_v7 = vld [vmem:[#allocation6 + $0x28] sm:$0xff]  ;;  %v48_v9 = vld [vmem:[#allocation3] sm:$0xff]  ;;  %v57_v11 = vld [vmem:[#allocation6 + $0x38] sm:$0xff]  ;;  %s304_s7 = scalar_lea.vmem %s158_s6, 256  ;;  %p309_p3 = scmp.lt.s32.totalorder %s158_s6, %s158_s6 }
  0x29   :  { %224 = vmatprep.subr.bf16.mxu0 %v223_v3  ;;  %v231_v8 = vpack.c.bf16 %v55_v7, %v54_v6  ;;  %v56_v10 = vld [vmem:[#allocation6 + $0x30] sm:$0xff]  ;;  %220 = vmatprep.mubr.f32.mxu0 %v48_v9  ;;  %v58_v13 = vld [vmem:[#allocation6 + $0x40] sm:$0xff]  ;;  %v59_v14 = vld [vmem:[#allocation6 + $0x48] sm:$0xff]  ;;  %p305_p2 = scmp.ne.s32.totalorder %s158_s6, %s304_s7  ;;  %p310_p4 = scmp.lt.s32.totalorder %s304_s7, %s304_s7 }
  0x2a   :  { %226 = vmatpush3.bf16.msra.mxu0 %v223_v3  ;;  %v235_v12 = vpack.c.bf16 %v57_v11, %v56_v10  ;;  %v239_v15 = vpack.c.bf16 %v59_v14, %v58_v13  ;;  %v60_v16 = vld [vmem:[#allocation6 + $0x50] sm:$0xff]  ;;  %v61_v17 = vld [vmem:[#allocation6 + $0x58] sm:$0xff]  ;;  %v62_v19 = vld [vmem:[#allocation6 + $0x60] sm:$0xff] }
  0x2b   :  { %228 = vmatprep.subr.bf16.mxu0 %v227_v5  ;;  %v243_v18 = vpack.c.bf16 %v61_v17, %v60_v16  ;;  %v63_v20 = vld [vmem:[#allocation6 + $0x68] sm:$0xff]  ;;  %v64_v22 = vld [vmem:[#allocation6 + $0x70] sm:$0xff]  ;;  %v65_v23 = vld [vmem:[#allocation6 + $0x78] sm:$0xff]  ;;  %p311_p5 = por %p310_p4, %p309_p3 }
  0x2c   :  { %v247_v21 = vpack.c.bf16 %v63_v20, %v62_v19  ;;  %v251_v24 = vpack.c.bf16 %v65_v23, %v64_v22  ;;  %v49_v25 = vld [vmem:[#allocation3 + $0x8] sm:$0xff] }
  0x2d   :  { %p312_p6 = pnand %p311_p5, %p305_p2 }
  0x2e   :  { %230 = vmatpush3.bf16.msra.mxu0 %v227_v5 }
  0x2f   :  { %232 = vmatprep.subr.bf16.mxu0 %v231_v8 }
  0x32   :  { %234 = vmatpush3.bf16.msra.mxu0 %v231_v8 }
  0x33   :  { %236 = vmatprep.subr.bf16.mxu0 %v235_v12 }
  0x36   :  { %238 = vmatpush3.bf16.msra.mxu0 %v235_v12 }
  0x37   :  { %240 = vmatprep.subr.bf16.mxu0 %v239_v15 }
  0x3a   :  { %242 = vmatpush3.bf16.msra.mxu0 %v239_v15 }
  0x3b   :  { %244 = vmatprep.subr.bf16.mxu0 %v243_v18 }
  0x3e   :  { %246 = vmatpush3.bf16.msra.mxu0 %v243_v18 }
  0x3f   :  { %248 = vmatprep.subr.bf16.mxu0 %v247_v21 }
  0x42   :  { %250 = vmatpush3.bf16.msra.mxu0 %v247_v21 }
  0x43   :  { %252 = vmatprep.subr.bf16.mxu0 %v251_v24 }
  0x46   :  { %254 = vmatpush3.bf16.msra.mxu0 %v251_v24 }
  0x49   :  { %221 = vmatmul.mubr.f32.vlgmr.msra.gmra.mrb[0].mxu0 %v49_v25 }
 0x11c   :  { %v222_v26 = vpop.f32.mrb[0].mxu0 }
 0x11d   :  { %151 = vst [vmem:[#allocation8 + $0x8] sm:$0xff] %v222_v26  ;;  %v132_v27 = vpop.f32.mrb[1].mxu0 }
 0x11e   :  { %150 = vst [vmem:[#allocation8] sm:$0xff] %v132_v27 }
 0x11f   :  { %315 = shalt.err (!%p312_p6)
}
 0x120   :  { %s316_s10 = scalar_lea.hbm %s399_s2, 256 }
 0x121   :  { %p317_p7 = scmp.ne.s32.totalorder %s399_s2, %s316_s10  ;;  %p320_p8 = scmp.lt.u32.totalorder %s316_s10, %s399_s2 }
 0x123   :  { %p322_p9 = pnand %p320_p8, %p317_p7 }
 0x125   :  { %325 = shalt.err (!%p322_p9)
}
 0x126   :  { %163 = dma.vmem_to_hbm [thread:$0]  %s158_s6, 256, %s399_s2, [#allocation5], %s333_s19, %s333_s19, %s334_s20  }
 0x127   :  { %330 = dma.done.wait [#allocation5], 256  }
 0x128   :  { %331 = vsyncadd [#allocation5], 4294967040 }
 0x129   :  { %167 = vsyncpa [#allocation4], 1 }
 0x12a   :  { %168 = vsyncpa [#allocation7], 1 }
 0x12b   :  { %169 = vsyncpa [#allocation5], 1 }

</bundles_post_ra>
